<compile_context>
chip_gen: v6e
topology: v6e:2x2x1
jax: 0.10.0
libtpu: 0.0.40
codegen_flags: <defaults>
</compile_context>

<pallas_src>
import jax
import jax.numpy as jnp
from jax import lax
from jax.experimental import pallas as pl
from jax.experimental.pallas import tpu as pltpu


def _make_kernel(ragged):
    """Streaming sum over the sequence axis with an (8, lane_tile) f32
    accumulator scratch; finalize does one cross-sublane reduce and a multiply
    by the precomputed reciprocal lengths."""

    def kernel(s_ref, x_ref, inv_ref, o_ref, acc_ref):
        k = pl.program_id(1)  # reduction (sequence) axis, last in the grid

        @pl.when(k == 0)
        def _():
            acc_ref[...] = jnp.zeros_like(acc_ref)

        seq_tile, lane_tile = x_ref.shape
        x = x_ref[...].astype(jnp.float32)
        if ragged:
            # Mask rows past the true sequence length (the last partial block's
            # VMEM tail holds stale data). Cheap VPU select, sits in VALU slack.
            start = k * seq_tile
            row = lax.broadcasted_iota(jnp.int32, x.shape, 0) + start
            x = jnp.where(row < s_ref[0], x, 0.0)

        # Vreg-aligned partial sums: adding (8, lane_tile) slabs is pure VPU
        # work (no per-step cross-sublane reduce, no 1-sublane masked RMW).
        acc_ref[...] += jnp.sum(x.reshape(seq_tile // 8, 8, lane_tile), axis=0)

        @pl.when(k == pl.num_programs(1) - 1)
        def _():
            o_ref[...] = (
                jnp.sum(acc_ref[...], axis=0, keepdims=True) * inv_ref[...]
            )

    return kernel


def _chip_config():
    """Generation-aware knobs. Detection is best-effort; defaults are safe."""
    kind = ""
    try:
        kind = jax.local_devices()[0].device_kind.lower()
    except Exception:
        pass
    if "v7" in kind:
        # 2 TensorCores/chip, only 64 MiB physical VMEM: modest blocks,
        # deeper input buffering to hide DMA issue latency on short steps.
        return dict(n_cores=2, target_bytes=4 * 1024 * 1024,
                    vmem_limit=32 * 1024 * 1024, deep_buffer=True)
    # v5e / v6e: single TensorCore, 128 MiB VMEM -> larger contiguous blocks,
    # fewer grid steps; raise the scoped VMEM limit accordingly.
    return dict(n_cores=1, target_bytes=8 * 1024 * 1024,
                vmem_limit=64 * 1024 * 1024, deep_buffer=False)


def _pick_tiles(S, F, itemsize, n_cores, target_bytes):
    """Choose (seq_tile, lane_tile, n_lane) obeying the (8, 128) block rules,
    keeping the double-buffered input block within the byte budget and (on
    2-TC chips) guaranteeing >= 2 parallel lane blocks when F allows it."""
    granule = max(8, 32 // itemsize)  # sublane packing granule for the dtype

    # Legal lane splits: lane_tile must divide F and be a multiple of 128
    # (otherwise the only legal choice is the full F).
    if F % 128 == 0:
        L = F // 128
        splits = [n for n in range(1, L + 1) if L % n == 0]
    else:
        splits = [1]

    # On 2-TC chips require >= 2 lane blocks when legal so both cores stream.
    # TODO(synk): when F cannot be split (F % 128 != 0 or F == 128), a v7x
    # sequence-split (two parallel partial sums added in the wrapper) would
    # recover the second TensorCore; not implemented here.
    min_split = 2 if (n_cores >= 2 and splits[-1] >= 2) else 1

    n_lane = None
    for n in splits:
        if n < min_split:
            continue
        if granule * (F // n) * itemsize <= target_bytes:
            n_lane = n
            break
    if n_lane is None:
        # Nothing fits the byte budget: take the finest legal split.
        eligible = [n for n in splits if n >= min_split] or splits
        n_lane = eligible[-1]
    lane_tile = F // n_lane

    seq_tile = (target_bytes // max(1, lane_tile * itemsize)) // granule * granule
    seq_tile = max(granule, min(seq_tile, -(-S // granule) * granule))
    return seq_tile, lane_tile, n_lane


def average_baseline(sentence_embed, sentence_len):
    """Pallas implementation of AverageBaseline.forward.

    sentence_embed: (S, B, H) float array (f32 or bf16)
    sentence_len:   (B,) int or float array
    returns:        (B, H) float32
    """
    S, B, H = sentence_embed.shape
    F = B * H
    itemsize = jnp.dtype(sentence_embed.dtype).itemsize

    cfg = _chip_config()
    seq_tile, lane_tile, n_lane = _pick_tiles(
        S, F, itemsize, cfg["n_cores"], cfg["target_bytes"])
    n_seq = -(-S // seq_tile)
    ragged = (S % seq_tile) != 0

    # Lane-dense slab (free reshape: (B, H) are the trailing contiguous dims).
    x = sentence_embed.reshape(S, F)

    # Precompute 1/len broadcast to the flattened (1, B*H) lane layout.
    # TODO(synk): zero sentence_len produces inf/nan, matching naive PyTorch.
    inv_flat = jnp.repeat(1.0 / sentence_len.astype(jnp.float32), H).reshape(1, F)

    # True sequence length for in-kernel tail masking (no jnp.pad HBM copy).
    s_scalar = jnp.array([S], dtype=jnp.int32)

    x_spec_kwargs = {}
    if cfg["deep_buffer"]:
        x_spec_kwargs["pipeline_mode"] = pl.Buffered(3)
    x_spec = pl.BlockSpec(
        (seq_tile, lane_tile), lambda i, k, s: (k, i), **x_spec_kwargs)

    out_flat = pl.pallas_call(
        _make_kernel(ragged),
        out_shape=jax.ShapeDtypeStruct((1, F), jnp.float32),
        grid_spec=pltpu.PrefetchScalarGridSpec(
            num_scalar_prefetch=1,
            grid=(n_lane, n_seq),  # reduction axis last
            in_specs=[
                x_spec,
                pl.BlockSpec((1, lane_tile), lambda i, k, s: (0, i)),
            ],
            out_specs=pl.BlockSpec((1, lane_tile), lambda i, k, s: (0, i)),
            scratch_shapes=[pltpu.VMEM((8, lane_tile), jnp.float32)],
        ),
        compiler_params=pltpu.CompilerParams(
            dimension_semantics=("parallel", "arbitrary"),
            vmem_limit_bytes=cfg["vmem_limit"],
        ),
    )(s_scalar, x, inv_flat)

    return out_flat.reshape(B, H)


if __name__ == "__main__":
    key = jax.random.PRNGKey(0)
    k_embed, k_len = jax.random.split(key)

    S, B, H = 8, 2, 32  # seq=8, batch=2, hidden=32
    sentence_embed = jax.random.normal(k_embed, (S, B, H), dtype=jnp.float32)
    sentence_len = jax.random.randint(k_len, (B,), minval=1, maxval=S + 1)

    out = average_baseline(sentence_embed, sentence_len)
    out = jax.block_until_ready(out)

    # Pure-JAX reference (same semantics as the PyTorch module).
    ref = jnp.sum(sentence_embed, axis=0) / sentence_len.astype(jnp.float32)[:, None]

    assert out.shape == (B, H)
    assert jnp.allclose(out, ref, atol=1e-5, rtol=1e-5)
    print("KERNEL_OK")
</pallas_src>

<mosaic_0001>
module attributes {stable_mosaic.version = 11 : i64} {
  func.func @kernel(%arg0: i32, %arg1: i32, %arg2: memref<1xi32, #tpu.memory_space<smem>>, %arg3: memref<8x64xf32, #tpu.memory_space<vmem>>, %arg4: memref<1x64xf32, #tpu.memory_space<vmem>>, %arg5: memref<1x64xf32, #tpu.memory_space<vmem>>, %arg6: memref<8x64xf32, #tpu.memory_space<vmem>>) attributes {dimension_semantics = [#tpu.dimension_semantics<parallel>, #tpu.dimension_semantics<arbitrary>], iteration_bounds = array<i64: 1, 1>, scalar_prefetch = 1 : i64, scratch_operands = 1 : i64, tpu.core_type = #tpu.core_type<tc>, window_params = [{transform_indices = @transform_0, window_bounds = array<i64: 8, 64>}, {transform_indices = @transform_1, window_bounds = array<i64: 1, 64>}, {transform_indices = @transform_2, window_bounds = array<i64: 1, 64>}]} {
    %c0_i32 = arith.constant 0 : i32
    %0 = arith.cmpi eq, %arg1, %c0_i32 : i32
    %1 = arith.extui %0 : i1 to i32
    %c0_i32_0 = arith.constant 0 : i32
    %2 = arith.cmpi ne, %1, %c0_i32_0 : i32
    scf.if %2 {
      %cst_8 = arith.constant 0.000000e+00 : f32
      %12 = vector.broadcast %cst_8 : f32 to vector<8x64xf32>
      %c0_9 = arith.constant 0 : index
      %c0_10 = arith.constant 0 : index
      %13 = vector.load %arg6[%c0_9, %c0_10] : memref<8x64xf32, #tpu.memory_space<vmem>>, vector<8x64xf32>
      tpu.vector_store %arg6[%c0_9, %c0_10], %12 {strides = array<i32>} : memref<8x64xf32, #tpu.memory_space<vmem>>, vector<8x64xf32>,
    } else {
    }
    %c0 = arith.constant 0 : index
    %c0_1 = arith.constant 0 : index
    %3 = vector.load %arg3[%c0, %c0_1] : memref<8x64xf32, #tpu.memory_space<vmem>>, vector<8x64xf32>
    %c0_2 = arith.constant 0 : index
    %c0_3 = arith.constant 0 : index
    %4 = vector.load %arg6[%c0_2, %c0_3] : memref<8x64xf32, #tpu.memory_space<vmem>>, vector<8x64xf32>
    %5 = vector.shape_cast %3 : vector<8x64xf32> to vector<1x8x64xf32>
    %cst = arith.constant dense<0.000000e+00> : vector<8x64xf32>
    %6 = vector.multi_reduction <add>, %5, %cst [0] : vector<1x8x64xf32> to vector<8x64xf32>
    %7 = arith.addf %4, %6 : vector<8x64xf32>
    %c0_4 = arith.constant 0 : index
    %c0_5 = arith.constant 0 : index
    %8 = vector.load %arg6[%c0_4, %c0_5] : memref<8x64xf32, #tpu.memory_space<vmem>>, vector<8x64xf32>
    tpu.vector_store %arg6[%c0_4, %c0_5], %7 {strides = array<i32>} : memref<8x64xf32, #tpu.memory_space<vmem>>, vector<8x64xf32>,
    %c0_i32_6 = arith.constant 0 : i32
    %9 = arith.cmpi eq, %arg1, %c0_i32_6 : i32
    %10 = arith.extui %9 : i1 to i32
    %c0_i32_7 = arith.constant 0 : i32
    %11 = arith.cmpi ne, %10, %c0_i32_7 : i32
    scf.if %11 {
      %c0_8 = arith.constant 0 : index
      %c0_9 = arith.constant 0 : index
      %12 = vector.load %arg6[%c0_8, %c0_9] : memref<8x64xf32, #tpu.memory_space<vmem>>, vector<8x64xf32>
      %cst_10 = arith.constant dense<0.000000e+00> : vector<64xf32>
      %13 = vector.multi_reduction <add>, %12, %cst_10 [0] : vector<8x64xf32> to vector<64xf32>
      %14 = vector.shape_cast %13 : vector<64xf32> to vector<1x64xf32>
      %c0_11 = arith.constant 0 : index
      %c0_12 = arith.constant 0 : index
      %15 = vector.load %arg4[%c0_11, %c0_12] : memref<1x64xf32, #tpu.memory_space<vmem>>, vector<1x64xf32>
      %16 = arith.mulf %14, %15 : vector<1x64xf32>
      %c0_13 = arith.constant 0 : index
      %c0_14 = arith.constant 0 : index
      %17 = vector.load %arg5[%c0_13, %c0_14] : memref<1x64xf32, #tpu.memory_space<vmem>>, vector<1x64xf32>
      tpu.vector_store %arg5[%c0_13, %c0_14], %16 {strides = array<i32>} : memref<1x64xf32, #tpu.memory_space<vmem>>, vector<1x64xf32>,
    } else {
    }
    return
  }
  func.func @transform_0(%arg0: i32, %arg1: i32, %arg2: memref<1xi32, #tpu.memory_space<smem>>) -> (i32, i32) {
    %c0_i32 = arith.constant 0 : i32
    return %arg1, %arg0 : i32, i32
  }
  func.func @transform_1(%arg0: i32, %arg1: i32, %arg2: memref<1xi32, #tpu.memory_space<smem>>) -> (i32, i32) {
    %c0_i32 = arith.constant 0 : i32
    %c0_i32_0 = arith.constant 0 : i32
    return %c0_i32, %arg0 : i32, i32
  }
  func.func @transform_2(%arg0: i32, %arg1: i32, %arg2: memref<1xi32, #tpu.memory_space<smem>>) -> (i32, i32) {
    %c0_i32 = arith.constant 0 : i32
    %c0_i32_0 = arith.constant 0 : i32
    return %c0_i32, %arg0 : i32, i32
  }
}

</mosaic_0001>

<bundles_post_ra>
// kernel: tpu_custom_call.1
= control target key start
LH: loop header
LB: loop body
LE: loop exit
PB: predicated region body
PF: predicated region fallthrough
CT: control target
= control target key end

     0   :  { %9 = vsyncpa [#allocation6], 0  ;;  %s147_s0 = inlined_call_operand.<no memory space> [shape: s32[1], index: 0, kind: input, shape index: {}]   ;;  %s148_s1 = inlined_call_operand.hbm [shape: f32[8,64], index: 1, kind: input, shape index: {}]   ;;  %s149_s2 = inlined_call_operand.vmem [shape: f32[1,64], index: 2, kind: input, shape index: {}]   ;;  %s150_s3 = inlined_call_operand.hbm [shape: f32[1,64], index: 3, kind: output, shape index: {}]  }
   0x1   :  { %10 = vsyncpa [#allocation7], 0  ;;  %s115_s12 = smov [#allocation5]  }
   0x2   :  { %s17_s13 = sshll.u32 %s115_s12, 4  ;;  %s18_s13 = int_to_ptr.vmem [resolvable:$true] %s17_s13 }
   0x3   :  { %s79_s14 = scalar_lea.vmem %s18_s13, 128  ;;  %p84_p1 = scmp.lt.s32.totalorder %s18_s13, %s18_s13 }
   0x4   :  { %p80_p0 = scmp.ne.s32.totalorder %s18_s13, %s79_s14  ;;  %p85_p2 = scmp.lt.s32.totalorder %s79_s14, %s79_s14 }
   0x6   :  { %p86_p3 = por %p85_p2, %p84_p1 }
   0x8   :  { %p87_p4 = pnand %p86_p3, %p80_p0 }
   0xa   :  { %90 = shalt.err (!%p87_p4)
}
   0xb   :  { %20 = dma.hbm_to_vmem [thread:$0]  %s148_s1, 128, %s18_s13, [#allocation6]  }
   0xc   :  { %111 = dma.done.wait [#allocation6], 128  }
   0xd   :  { %112 = vsyncadd [#allocation6], 4294967168  ;;  %vm30_vm0 = vcmask 523264   ;;  %v116_v0 = vmov 0.0   ;;  %v32_v1 = vld [vmem:[#allocation5] sm:$0xff]  ;;  %s117_s1 = smov [#allocation8]  }
   0xe   :  { %31 = vst.msk [vmem:[#allocation2] sm:$0xff] %vm30_vm0, %v116_v0  ;;  %v49_v11 = vld [vmem:[%s149_s2] sm:$0x1]  ;;  %s59_s18 = sshll.u32 %s117_s1, 4  ;;  %vm51_vm1 = vcmask 516096   ;;  %s60_s18 = int_to_ptr.vmem [resolvable:$true] %s59_s18 }
   0xf   :  { %s91_s19 = scalar_lea.vmem %s60_s18, 16  ;;  %s95_s20 = scalar_lea.vmem %s60_s18, 32 }
  0x10   :  { %p92_p5 = scmp.ne.s32.totalorder %s60_s18, %s91_s19  ;;  %p96_p6 = scmp.lt.s32.totalorder %s60_s18, %s60_s18 }
  0x11   :  { %p97_p7 = scmp.lt.s32.totalorder %s95_s20, %s91_s19 }
  0x13   :  { %p98_p8 = por %p97_p7, %p96_p6 }
  0x15   :  { %v33_v2 = vld [vmem:[#allocation2] sm:$0xff]  ;;  %p99_p9 = pnand %p98_p8, %p92_p5 }
  0x16   :  { %v35_v3 = vadd.f32 %v33_v2, %v32_v1 }
  0x18   :  { %37 = vst.msk [vmem:[#allocation2] sm:$0xff] %vm30_vm0, %v35_v3 }
  0x1f   :  { %v41_v4 = vld [vmem:[#allocation2] sm:$0xff] }
  0x20   :  { %v42_v5 = vsel %vm30_vm0, %v41_v4, 0.0 }
  0x21   :  { %v43_v6 = vrot.slane %v42_v5, 4 }
  0x23   :  { %v44_v7 = vadd.f32 %v43_v6, %v42_v5 }
  0x25   :  { %v45_v8 = vrot.slane %v44_v7, 2 }
  0x27   :  { %v46_v9 = vadd.f32 %v45_v8, %v44_v7 }
  0x29   :  { %v47_v10 = vrot.slane %v46_v9, 1 }
  0x2b   :  { %v48_v12 = vadd.f32 %v47_v10, %v46_v9 }
  0x2d   :  { %v50_v13 = vmul.f32 %v49_v11, %v48_v12 }
  0x2f   :  { %52 = vst.msk [vmem:[#allocation8] sm:$0x1] %vm51_vm1, %v50_v13 }
  0x30   :  { %102 = shalt.err (!%p99_p9)
}
  0x31   :  { %62 = dma.vmem_to_hbm [thread:$0]  %s60_s18, 16, %s150_s3, [#allocation7]  }
  0x32   :  { %113 = dma.done.wait [#allocation7], 16  }
  0x33   :  { %114 = vsyncadd [#allocation7], 4294967280 }
  0x34   :  { %66 = vsyncpa [#allocation6], 1 }
  0x35   :  { %67 = vsyncpa [#allocation7], 1 }

</bundles_post_ra>
